<compile_context>
chip_gen: v5e
topology: v5e:2x2
jax: 0.10.0
libtpu: 0.0.40
codegen_flags: <defaults>
</compile_context>

<pallas_src>
import functools

import jax
import jax.numpy as jnp
from jax.experimental import pallas as pl
from jax.experimental.pallas import tpu as pltpu

ALPHA = 0.25
GAMMA = 2.0


def _round_up(v, m):
    return -(-v // m) * m


def _focal_loss_elements(x, t, alpha, gamma):
    """Per-element focal loss, f32 in / f32 out. alpha/gamma are static."""
    # Stable BCE-with-logits (reduction='none'):
    #   max(x, 0) - x*t + log1p(exp(-|x|))
    e = jnp.exp(-jnp.abs(x))                      # single transcendental, reused below
    bce = jnp.maximum(x, 0.0) - x * t + jnp.log1p(e)

    # Exact sigmoid from the same exp:  x >= 0 -> 1/(1+e),  x < 0 -> e/(1+e).
    p = jnp.where(x >= 0.0, 1.0, e) / (1.0 + e)

    # 1 - pt  with pt = p*t + (1-p)*(1-t)  ==>  p + t - 2*p*t   (fewer VPU ops)
    one_minus_pt = p + t - 2.0 * (p * t)

    g = float(gamma)
    if g == 2.0:                                  # fast path: no log/exp
        pw = one_minus_pt * one_minus_pt
    elif g == 1.0:
        pw = one_minus_pt
    elif g == 0.0:
        pw = jnp.ones_like(one_minus_pt)
    elif g.is_integer() and 0.0 < g <= 8.0:
        pw = one_minus_pt
        for _ in range(int(g) - 1):
            pw = pw * one_minus_pt
    else:
        pw = jnp.power(jnp.maximum(one_minus_pt, 0.0), g)  # clamp: avoid NaN at pt==1

    return (alpha * pw) * bce


def _focal_partial_kernel(x_ref, t_ref, part_ref, *, alpha, gamma, n_valid):
    x = x_ref[...].astype(jnp.float32)
    t = t_ref[...].astype(jnp.float32)
    loss = _focal_loss_elements(x, t, alpha, gamma)
    rows, c = loss.shape
    if n_valid is not None:
        # Grid does not divide N: zero the out-of-range rows of the last block.
        row0 = pl.program_id(0) * rows
        ridx = row0 + jax.lax.broadcasted_iota(jnp.int32, (rows, c), 0)
        loss = jnp.where(ridx < n_valid, loss, 0.0)
    if rows % 8 == 0:
        # Fold to an (8, C) lane-dense partial block with plain VPU adds:
        # unmasked stores, no cross-sublane XLU reduce inside the kernel.
        part_ref[...] = jnp.sum(loss.reshape(rows // 8, 8, c), axis=0)
    else:
        # Only reachable when the whole (tiny) array has fewer than 8 rows.
        part_ref[...] = jnp.sum(loss, axis=0, keepdims=True)


def _focal_none_kernel(x_ref, t_ref, loss_ref, *, alpha, gamma):
    x = x_ref[...].astype(jnp.float32)
    t = t_ref[...].astype(jnp.float32)
    loss_ref[...] = _focal_loss_elements(x, t, alpha, gamma).astype(loss_ref.dtype)


def _pick_row_tile(n, row_bytes, max_tile_bytes):
    """Multiple-of-8 row tile (<= n), sized for ~max_tile_bytes per input and
    giving at least 2 grid steps for anything larger than one tile (v7x: 2 TCs)."""
    if n < 8:
        return n                                   # tiny array: one full-dim block
    max_rows = max(8, (max_tile_bytes // max(row_bytes, 1)) // 8 * 8)
    two_step = max(8, _round_up(pl.cdiv(n, 2), 8))  # always <= n for n >= 8
    return min(max_rows, two_step)


def _vmem_limit_bytes(in_tile_bytes, out_tile_bytes):
    # 2 inputs + 1 output, each double-buffered by the BlockSpec pipeline,
    # plus headroom.  Capped below v7x's 64 MiB physical VMEM.
    footprint = 2 * in_tile_bytes + 2 * out_tile_bytes
    return int(min(48 << 20, max(footprint + (4 << 20), 16 << 20)))


def focal_loss(inputs, targets, alpha=ALPHA, gamma=GAMMA, reduction="mean",
               max_tile_bytes=4 << 20):
    """Focal loss matching the PyTorch FocalLoss module. inputs/targets: (N, C)."""
    assert inputs.shape == targets.shape
    orig_n, orig_c = inputs.shape

    if reduction in ("mean", "sum") and orig_c % 128 != 0 and (orig_n * orig_c) % 128 == 0:
        # Lane-dense slab: the global reduction is layout-agnostic, so present
        # 128-wide rows instead of wasting (128 - C) lanes of every vreg.
        x2 = inputs.reshape(orig_n * orig_c // 128, 128)
        t2 = targets.reshape(orig_n * orig_c // 128, 128)
    else:
        x2, t2 = inputs, targets
    n, c = x2.shape

    row_bytes = c * max(x2.dtype.itemsize, t2.dtype.itemsize)
    row_tile = _pick_row_tile(n, row_bytes, max_tile_bytes)
    grid = (pl.cdiv(n, row_tile),)
    n_valid = n if grid[0] * row_tile != n else None   # mask only when needed

    in_tile_bytes = row_tile * c * (x2.dtype.itemsize + t2.dtype.itemsize)
    in_specs = [
        pl.BlockSpec((row_tile, c), lambda i: (i, 0)),
        pl.BlockSpec((row_tile, c), lambda i: (i, 0)),
    ]

    if reduction == "none":
        out_dtype = inputs.dtype                    # bf16 in -> bf16 out (halves writeback)
        out_tile_bytes = row_tile * c * jnp.dtype(out_dtype).itemsize
        kernel = functools.partial(_focal_none_kernel, alpha=alpha, gamma=gamma)
        return pl.pallas_call(
            kernel,
            out_shape=jax.ShapeDtypeStruct((n, c), out_dtype),
            grid_spec=pltpu.PrefetchScalarGridSpec(
                num_scalar_prefetch=0,
                grid=grid,
                in_specs=in_specs,
                out_specs=pl.BlockSpec((row_tile, c), lambda i: (i, 0)),
            ),
            compiler_params=pltpu.CompilerParams(
                dimension_semantics=("parallel",),
                vmem_limit_bytes=_vmem_limit_bytes(in_tile_bytes, out_tile_bytes),
            ),
        )(x2, t2)

    # sum / mean: each grid step writes its own lane-dense (8, C) partial-sum
    # block (grid axis stays "parallel"); the tiny cross-block + cross-lane
    # reduction happens once in XLA below.
    part_rows = 8 if row_tile % 8 == 0 else 1
    kernel = functools.partial(_focal_partial_kernel, alpha=alpha, gamma=gamma,
                               n_valid=n_valid)
    partials = pl.pallas_call(
        kernel,
        out_shape=jax.ShapeDtypeStruct((grid[0] * part_rows, c), jnp.float32),
        grid_spec=pltpu.PrefetchScalarGridSpec(
            num_scalar_prefetch=0,
            grid=grid,
            in_specs=in_specs,
            out_specs=pl.BlockSpec((part_rows, c), lambda i: (i, 0)),
        ),
        compiler_params=pltpu.CompilerParams(
            dimension_semantics=("parallel",),
            vmem_limit_bytes=_vmem_limit_bytes(in_tile_bytes, part_rows * c * 4),
        ),
    )(x2, t2)

    total = jnp.sum(partials)
    if reduction == "sum":
        return total
    return total / jnp.float32(orig_n * orig_c)     # 'mean'


def focal_loss_ref(inputs, targets, alpha=ALPHA, gamma=GAMMA, reduction="mean"):
    x = inputs.astype(jnp.float32)
    t = targets.astype(jnp.float32)
    bce = jnp.maximum(x, 0.0) - x * t + jnp.log1p(jnp.exp(-jnp.abs(x)))
    p = jax.nn.sigmoid(x)
    pt = p * t + (1.0 - p) * (1.0 - t)
    loss = alpha * (1.0 - pt) ** gamma * bce
    if reduction == "mean":
        return jnp.mean(loss)
    if reduction == "sum":
        return jnp.sum(loss)
    return loss


if __name__ == "__main__":
    key = jax.random.PRNGKey(0)
    k1, k2, k3, k4, k5, k6, k7, k8 = jax.random.split(key, 8)

    # Small multi-label classification shapes: batch=16, num_labels=128.
    N, C = 16, 128
    logits = jax.random.normal(k1, (N, C), dtype=jnp.float32) * 2.0
    tgt_bits = jax.random.uniform(k2, (N, C)) > 0.7
    targets = tgt_bits.astype(jnp.float32)
    targets_bf16 = tgt_bits.astype(jnp.bfloat16)   # {0,1} exactly; halves target HBM bytes

    # 'mean' (module default).
    loss = jax.block_until_ready(focal_loss(logits, targets_bf16))
    ref = focal_loss_ref(logits, targets)
    assert jnp.allclose(loss, ref, rtol=1e-5, atol=1e-6), (loss, ref)

    # 'sum' reduction on the same inputs.
    loss_sum = jax.block_until_ready(focal_loss(logits, targets_bf16, reduction="sum"))
    ref_sum = focal_loss_ref(logits, targets, reduction="sum")
    assert jnp.allclose(loss_sum, ref_sum, rtol=1e-5, atol=1e-5), (loss_sum, ref_sum)

    # 'none' reduction (per-element loss).
    loss_none = jax.block_until_ready(focal_loss(logits, targets_bf16, reduction="none"))
    ref_none = focal_loss_ref(logits, targets, reduction="none")
    assert jnp.allclose(loss_none, ref_none, rtol=2e-5, atol=2e-6)

    # Multi-block path: shrink the tile budget so N=64 splits into 4 parallel blocks.
    N2 = 64
    logits2 = jax.random.normal(k3, (N2, C), dtype=jnp.float32) * 2.0
    targets2 = (jax.random.uniform(k4, (N2, C)) > 0.7).astype(jnp.float32)
    loss2 = jax.block_until_ready(
        focal_loss(logits2, targets2, max_tile_bytes=8 * 1024))
    ref2 = focal_loss_ref(logits2, targets2)
    assert jnp.allclose(loss2, ref2, rtol=1e-5, atol=1e-6), (loss2, ref2)

    # Ragged N (not a multiple of the row tile): cdiv grid + in-kernel row mask.
    N3 = 20
    logits3 = jax.random.normal(k5, (N3, C), dtype=jnp.float32) * 2.0
    targets3 = (jax.random.uniform(k6, (N3, C)) > 0.7).astype(jnp.float32)
    loss3 = jax.block_until_ready(focal_loss(logits3, targets3))
    ref3 = focal_loss_ref(logits3, targets3)
    assert jnp.allclose(loss3, ref3, rtol=1e-5, atol=1e-6), (loss3, ref3)

    # Narrow-C case: wrapper flattens to a lane-dense (rows, 128) slab.
    N4, C4 = 16, 32
    logits4 = jax.random.normal(k7, (N4, C4), dtype=jnp.float32) * 2.0
    targets4 = (jax.random.uniform(k8, (N4, C4)) > 0.7).astype(jnp.float32)
    loss4 = jax.block_until_ready(focal_loss(logits4, targets4))
    ref4 = focal_loss_ref(logits4, targets4)
    assert jnp.allclose(loss4, ref4, rtol=1e-5, atol=1e-6), (loss4, ref4)

    print("KERNEL_OK")
</pallas_src>

<mosaic_0001>
module attributes {stable_mosaic.version = 11 : i64} {
  func.func @_focal_partial_kernel(%arg0: i32, %arg1: memref<8x128xf32, #tpu.memory_space<vmem>>, %arg2: memref<8x128xbf16, #tpu.memory_space<vmem>>, %arg3: memref<8x128xf32, #tpu.memory_space<vmem>>) attributes {dimension_semantics = [#tpu.dimension_semantics<parallel>], iteration_bounds = array<i64: 2>, scalar_prefetch = 0 : i64, scratch_operands = 0 : i64, tpu.core_type = #tpu.core_type<tc>, window_params = [{transform_indices = @transform_0, window_bounds = array<i64: 8, 128>}, {transform_indices = @transform_1, window_bounds = array<i64: 8, 128>}, {transform_indices = @transform_2, window_bounds = array<i64: 8, 128>}]} {
    %c0 = arith.constant 0 : index
    %c0_0 = arith.constant 0 : index
    %0 = vector.load %arg1[%c0, %c0_0] : memref<8x128xf32, #tpu.memory_space<vmem>>, vector<8x128xf32>
    %c0_1 = arith.constant 0 : index
    %c0_2 = arith.constant 0 : index
    %1 = vector.load %arg2[%c0_1, %c0_2] : memref<8x128xbf16, #tpu.memory_space<vmem>>, vector<8x128xbf16>
    %2 = arith.extf %1 : vector<8x128xbf16> to vector<8x128xf32>
    %3 = math.absf %0 : vector<8x128xf32>
    %cst = arith.constant 0.000000e+00 : f32
    %4 = vector.broadcast %cst : f32 to vector<8x128xf32>
    %5 = arith.subf %4, %3 : vector<8x128xf32>
    %6 = math.exp %5 : vector<8x128xf32>
    %cst_3 = arith.constant 0.000000e+00 : f32
    %7 = vector.broadcast %cst_3 : f32 to vector<8x128xf32>
    %8 = arith.maximumf %0, %7 : vector<8x128xf32>
    %9 = arith.mulf %0, %2 : vector<8x128xf32>
    %10 = arith.subf %8, %9 : vector<8x128xf32>
    %11 = math.log1p %6 : vector<8x128xf32>
    %12 = arith.addf %10, %11 : vector<8x128xf32>
    %cst_4 = arith.constant 0.000000e+00 : f32
    %13 = vector.broadcast %cst_4 : f32 to vector<8x128xf32>
    %14 = arith.cmpf oge, %0, %13 : vector<8x128xf32>
    %cst_5 = arith.constant 1.000000e+00 : f32
    %15 = vector.broadcast %cst_5 : f32 to vector<8x128xf32>
    %16 = arith.select %14, %15, %6 : vector<8x128xi1>, vector<8x128xf32>
    %cst_6 = arith.constant 1.000000e+00 : f32
    %17 = vector.broadcast %cst_6 : f32 to vector<8x128xf32>
    %18 = arith.addf %17, %6 : vector<8x128xf32>
    %19 = arith.divf %16, %18 : vector<8x128xf32>
    %20 = arith.addf %19, %2 : vector<8x128xf32>
    %21 = arith.mulf %19, %2 : vector<8x128xf32>
    %cst_7 = arith.constant 2.000000e+00 : f32
    %22 = vector.broadcast %cst_7 : f32 to vector<8x128xf32>
    %23 = arith.mulf %22, %21 : vector<8x128xf32>
    %24 = arith.subf %20, %23 : vector<8x128xf32>
    %25 = arith.mulf %24, %24 : vector<8x128xf32>
    %cst_8 = arith.constant 2.500000e-01 : f32
    %26 = vector.broadcast %cst_8 : f32 to vector<8x128xf32>
    %27 = arith.mulf %26, %25 : vector<8x128xf32>
    %28 = arith.mulf %27, %12 : vector<8x128xf32>
    %29 = vector.shape_cast %28 : vector<8x128xf32> to vector<1x8x128xf32>
    %cst_9 = arith.constant dense<0.000000e+00> : vector<8x128xf32>
    %30 = vector.multi_reduction <add>, %29, %cst_9 [0] : vector<1x8x128xf32> to vector<8x128xf32>
    %c0_10 = arith.constant 0 : index
    %c0_11 = arith.constant 0 : index
    %31 = vector.load %arg3[%c0_10, %c0_11] : memref<8x128xf32, #tpu.memory_space<vmem>>, vector<8x128xf32>
    tpu.vector_store %arg3[%c0_10, %c0_11], %30 {strides = array<i32>} : memref<8x128xf32, #tpu.memory_space<vmem>>, vector<8x128xf32>,
    return
  }
  func.func @transform_0(%arg0: i32) -> (i32, i32) {
    %c0_i32 = arith.constant 0 : i32
    %c0_i32_0 = arith.constant 0 : i32
    return %arg0, %c0_i32 : i32, i32
  }
  func.func @transform_1(%arg0: i32) -> (i32, i32) {
    %c0_i32 = arith.constant 0 : i32
    %c0_i32_0 = arith.constant 0 : i32
    return %arg0, %c0_i32 : i32, i32
  }
  func.func @transform_2(%arg0: i32) -> (i32, i32) {
    %c0_i32 = arith.constant 0 : i32
    %c0_i32_0 = arith.constant 0 : i32
    return %arg0, %c0_i32 : i32, i32
  }
}

</mosaic_0001>

<bundles_post_ra>
// kernel: tpu_custom_call.1
= control target key start
LH: loop header
LB: loop body
LE: loop exit
PB: predicated region body
PF: predicated region fallthrough
CT: control target
= control target key end

     0   :  { %7 = vsyncpa [#allocation3], 0  ;;  %s742_s0 = inlined_call_operand.hbm [shape: f32[16,128], index: 0, kind: input, shape index: {}]   ;;  %s743_s1 = inlined_call_operand.hbm [shape: bf16[16,128], index: 1, kind: input, shape index: {}]   ;;  %s744_s2 = inlined_call_operand.hbm [shape: f32[16,128], index: 2, kind: output, shape index: {}]  }
   0x1   :  { %9 = vsyncpa [#allocation3 + $0x1], 0 }
   0x2   :  { %10 = vsyncpa [#allocation6], 0 }
   0x3   :  { %12 = vsyncpa [#allocation6 + $0x1], 0 }
   0x4   :  { %13 = vsyncpa [#allocation4], 0 }
   0x5   :  { %15 = vsyncpa [#allocation4 + $0x1], 0  ;;  %s575_s9 = smov 0   ;;  %s577_s10 = smov 0  }
   0x6   :  { %s579_s11 = smov 0   ;;  %s581_s12 = smov 0  }
   0x7 LB: > { %s596_s13 = sadd.s32 4294967295, %s558_s12   ;;  %s356_s14 = sadd.s32 4294967294, %s558_s12   ;;  %s558_s12 = sphi %s581_s12, %s755_s12   ;;  %s554_s11 = sphi %s579_s11, %s754_s11   ;;  %s550_s10 = sphi %s577_s10, %s753_s10   ;;  %s546_s9 = sphi %s575_s9, %s752_s9  }
   0x8   : > { %s600_s15 = sadd.s32 1, %s558_s12   ;;  %s28_s16 = sadd.s32 1, %s554_s11 }
   0x9   : > { %s25_s17 = ssub.s32 %s558_s12, %s600_s15  ;;  %p35_p0 = scmp.ne.s32.totalorder %s554_s11, %s550_s10 }
   0xa   : > { %p26_p1 = scmp.eq.s32.totalorder %s25_s17, 0  ;;  %p36_p2 = scmp.eq.s32.totalorder %s558_s12, 0 }
   0xb   : > { %p41_p3 = scmp.ne.s32.totalorder %s550_s10, %s546_s9  ;;  %p42_p4 = scmp.eq.s32.totalorder %s596_s13, 0 }
   0xc   : > { %s612_s18 = scalar_select %p26_p1, %s554_s11, %s28_s16  }
   0xd   : > { %p614_p5 = por %p36_p2, %p35_p0  ;;  %p618_p6 = por %p42_p4, %p41_p3 }
   0xe   : > { %p91_p7 = scmp.eq.s32.totalorder %s596_s13, 1  ;;  %p97_p8 = scmp.eq.s32.totalorder %s356_s14, 1 }
   0xf   : > { %p388_p10 = scmp.lt.s32.totalorder %s558_s12, 2  ;;  %s634_s23 = sand.u32 1, %s554_s11  }
  0x10   : > { %p625_p11 = por %p91_p7, %p35_p0  ;;  %p629_p12 = por %p97_p8, %p41_p3 }
  0x11   : > { %s360_s24 = sshll.u32 %s558_s12, 3  ;;  %s359_s25 = sshll.u32 %s634_s23, 3 }
  0x12   : > { %s125_s28 = scalar_lea.hbm %s742_s0, %s360_s24  ;;  %s121_s30 = scalar_lea.vmem [#allocation2], %s359_s25 }
  0x13   : > { %s127_s29 = sshll.u32 %s125_s28, 4  ;;  %s129_s3 = sshll.u32 %s121_s30, 4  ;;  %s128_s29 = int_to_ptr.hbm [resolvable:$true] %s127_s29  ;;  %s130_s3 = int_to_ptr.vmem [resolvable:$true] %s129_s3 }
  0x14   : > { %p643_p13 = pnand %p388_p10, %p614_p5  ;;  %p363_p0 = scmp.ge.s32.totalorder %s558_s12, 1 }
  0x15   : > { %p153_p1 = scmp.lt.s32.totalorder %s558_s12, 3  ;;  %s361_s5 = sshll.u32 %s634_s23, 2 }
  0x16   : > { %s118_s6 = scalar_lea.sflag [#allocation3], %s634_s23  ;;  %s428_s7 = sshra.s32 %s128_s29, 4  ;;  %s429_s7 = int_to_ptr.hbm [resolvable:$true] %s428_s7 }
  0x17   : > { %s430_s8 = scalar_lea.hbm %s429_s7, 8  ;;  %p432_p3 = pneg %p643_p13 }
  0x18   : > { %p431_p2 = scmp.ne.s32.totalorder %s429_s7, %s430_s8  ;;  %s435_s17 = scalar_lea.hbm %s742_s0, 16 }
  0x19   : > { %p436_p5 = scmp.lt.s32.totalorder %s429_s7, %s742_s0  ;;  %p437_p8 = scmp.lt.s32.totalorder %s435_s17, %s430_s8 }
  0x1a   : > { %p433_p4 = pnand %p432_p3, %p431_p2 }
  0x1b   : > { %p438_p10 = por %p437_p8, %p436_p5 }
  0x1c   : > { %p434_p7 = pneg %p433_p4 }
  0x1e   : > { %p439_p9 = pnand %p438_p10, %p434_p7 }
  0x20   : > { %442 = shalt.err (!%p439_p9)
}
  0x21   : > { %380 = dma.hbm_to_vmem [thread:$0]  (!%p643_p13), %s128_s29, 128, %s130_s3, %s118_s6  }
  0x22   : > { %p668_p2 = pnand %p363_p0, %p153_p1  ;;  %s362_s26 = sshll.u32 %s558_s12, 2 }
  0x23   : > { %s140_s27 = scalar_lea.vmem [#allocation5], %s361_s5  ;;  %s144_s8 = scalar_lea.hbm %s743_s1, %s362_s26 }
  0x24   : > { %s148_s28 = sshll.u32 %s140_s27, 4  ;;  %s146_s14 = sshll.u32 %s144_s8, 4  ;;  %s149_s28 = int_to_ptr.vmem [resolvable:$true] %s148_s28  ;;  %s147_s14 = int_to_ptr.hbm [resolvable:$true] %s146_s14 }
  0x25   : > { %s137_s16 = scalar_lea.sflag [#allocation6], %s634_s23  ;;  %s458_s17 = sshra.s32 %s147_s14, 4  ;;  %s459_s17 = int_to_ptr.hbm [resolvable:$true] %s458_s17 }
  0x26   : > { %s460_s29 = scalar_lea.hbm %s459_s17, 4  ;;  %s465_s5 = scalar_lea.hbm %s743_s1, 8 }
  0x27   : > { %p461_p9 = scmp.ne.s32.totalorder %s459_s17, %s460_s29  ;;  %p466_p4 = scmp.lt.s32.totalorder %s459_s17, %s743_s1 }
  0x28   : > { %p467_p7 = scmp.lt.s32.totalorder %s465_s5, %s460_s29 }
  0x29   : > { %p463_p0 = pnand %p461_p9, %p432_p3 }
  0x2a   : > { %p468_p5 = por %p467_p7, %p466_p4 }
  0x2b   : > { %p464_p1 = pneg %p463_p0 }
  0x2d   : > { %p469_p8 = pnand %p468_p5, %p464_p1 }
  0x2f   : > { %472 = shalt.err (!%p469_p8)
}
  0x30   : > { %383 = dma.hbm_to_vmem [thread:$0]  (!%p643_p13), %s147_s14, 64, %s149_s28, %s137_s16  }
  0x31   : > { %157 = sbr.rel (%p668_p2) target bundleno = 108 (0x6c), region = 28  ;;  %s691_s23 = sand.u32 (!%p668_p2), 1, %s550_s10  }
  0x32   : > { %s364_s26 = sshll.u32 (!%p668_p2), %s691_s23, 3  ;;  %s160_s27 = scalar_lea.sflag (!%p668_p2), [#allocation3], %s691_s23 }
  0x33   : > { %s163_s30 = scalar_lea.vmem (!%p668_p2), [#allocation2], %s364_s26 }
  0x36   : > { %533 = dma.done.wait (%p618_p6), %s160_s27, 128  }
  0x37   : > { %535 = vsyncadd (%p618_p6), %s160_s27, 4294967168  ;;  %s365_s4 = sshll.u32 %s691_s23, 2  ;;  %s170_s25 = scalar_lea.sflag [#allocation6], %s691_s23 }
  0x38   : > { %s173_s28 = scalar_lea.vmem [#allocation5], %s365_s4 }
  0x39   : > { %537 = dma.done.wait (%p618_p6), %s170_s25, 64  }
  0x3a   : > { %539 = vsyncadd (%p618_p6), %s170_s25, 4294967232  ;;  %v200_v0 = vld [vmem:[%s163_s30] sm:$0xff]  ;;  %v201_v13 = vld [vmem:[%s173_s28] sm:$0xf]  ;;  %s368_s20 = sshll.u32 %s596_s13, 3  ;;  %s199_s16 = scalar_lea.vmem [#allocation7], %s364_s26 }
  0x3b   : > { %v203_v1 = vand.u32 2147483647, %v200_v0  ;;  %vm220_vm2 = vcmp.ge.f32.partialorder %v200_v0, 0.0  ;;  %v202_v19 = vunpack.c.l.bf16 %v201_v13  ;;  %v207_v23 = vmax.f32 %v200_v0, 0.0  ;;  %s258_s14 = scalar_lea.hbm %s744_s2, %s368_s20  ;;  %s260_s17 = sshll.u32 %s199_s16, 4  ;;  %s261_s17 = int_to_ptr.vmem [resolvable:$true] %s260_s17 }
  0x3c   : > { %s262_s29 = sshll.u32 %s258_s14, 4  ;;  %s248_s13 = scalar_lea.sflag [#allocation4], %s691_s23  ;;  %s263_s29 = int_to_ptr.hbm [resolvable:$true] %s262_s29 }
  0x3d   : > { %v204_v2 = vsub.f32 0.0, %v203_v1  ;;  %v208_v24 = vmul.f32 %v202_v19, %v200_v0  ;;  %s502_s3 = sshra.s32 %s263_s29, 4  ;;  %s508_s24 = scalar_lea.hbm %s744_s2, 16  ;;  %s503_s3 = int_to_ptr.hbm [resolvable:$true] %s502_s3 }
  0x3e   : > { %s504_s6 = scalar_lea.hbm %s503_s3, 8  ;;  %p509_p10 = scmp.lt.s32.totalorder %s503_s3, %s744_s2 }
  0x3f   : > { %v205_v3 = vmul.f32 1.442695, %v204_v2  ;;  %v209_v30 = vsub.f32 %v207_v23, %v208_v24  ;;  %p505_p6 = scmp.ne.s32.totalorder %s503_s3, %s504_s6  ;;  %p510_p2 = scmp.lt.s32.totalorder %s508_s24, %s504_s6 }
  0x41   : > { %422 = vpow2.f32 %v205_v3  ;;  %p506_p13 = pnand %p505_p6, %p625_p11  ;;  %p511_p9 = por %p510_p2, %p509_p10 }
  0x43   : > { %p507_p3 = pneg %p506_p13 }
  0x45   : > { %p512_p0 = pnand %p511_p9, %p507_p3 }
  0x47   : > { %v423_v4 = vpop.eup %422 }
  0x48   : > { %v210_v5 = vadd.f32 1.0, %v423_v4  ;;  %v213_v11 = vmul.f32 -0.5, %v423_v4  ;;  %v221_v18 = vsel %vm220_vm2, 1.0, %v423_v4  ;;  %v216_v20 = vand.u32 2147483647, %v423_v4 }
  0x4a   : > { %424 = vrcp.f32 %v210_v5  ;;  %v234_v8 = vand.u32 2147483648, %v210_v5  ;;  %vm228_vm0 = vweird.f32 %v210_v5  ;;  %v232_v10 = vand.u32 2147483647, %v210_v5 }
  0x4b   : > { %426 = vlog2.f32 %v210_v5  ;;  %v214_v17 = vadd.f32 1.0, %v213_v11  ;;  %vm217_vm5 = vcmp.lt.f32.partialorder %v216_v20, 0.0004427343 }
  0x4c   : > { %v235_v14 = vor.u32 1.1754944e-38, %v234_v8  ;;  %vm233_vm4 = vcmp.eq.f32.partialorder %v232_v10, 8.507059e+37 }
  0x4d   : > { %v215_v27 = vmul.f32 %v423_v4, %v214_v17 }
  0x50   : > { %v425_v6 = vpop.eup %424 }
  0x51   : > { %v224_v7 = vmul.f32 %v425_v6, %v210_v5  ;;  %vm229_vm1 = vweird.f32 %v425_v6  ;;  %v427_v16 = vpop.eup %426 }
  0x52   : > { %vm230_vm3 = vmor %vm228_vm0, %vm229_vm1  ;;  %v212_v26 = vmul.f32 0.6931472, %v427_v16 }
  0x53   : > { %v225_v9 = vsub.f32 1.0, %v224_v7 }
  0x54   : > { %v218_v32 = vsel %vm217_vm5, %v215_v27, %v212_v26 }
  0x55   : > { %v226_v12 = vmul.f32 %v425_v6, %v225_v9  ;;  %v219_v34 = vadd.f32 %v218_v32, %v209_v30 }
  0x57   : > { %v227_v15 = vadd.f32 %v425_v6, %v226_v12 }
  0x59   : > { %v231_v21 = vsel %vm230_vm3, %v425_v6, %v227_v15 }
  0x5a   : > { %v236_v22 = vsel %vm233_vm4, %v235_v14, %v231_v21 }
  0x5b   : > { %v237_v25 = vmul.f32 %v236_v22, %v221_v18 }
  0x5d   : > { %v238_v28 = vadd.f32 %v237_v25, %v202_v19  ;;  %v239_v29 = vmul.f32 %v237_v25, %v202_v19 }
  0x5f   : > { %v240_v31 = vmul.f32 2.0, %v239_v29 }
  0x61   : > { %v241_v33 = vsub.f32 %v238_v28, %v240_v31 }
  0x63   : > { %v242_v35 = vmul.f32 %v241_v33, %v241_v33 }
  0x65   : > { %v243_v36 = vmul.f32 0.25, %v242_v35 }
  0x67   : > { %v244_v37 = vmul.f32 %v243_v36, %v219_v34 }
  0x69   : > { %246 = vst [vmem:[%s199_s16] sm:$0xff] %v244_v37 }
  0x6a   : > { %515 = shalt.err (!%p512_p0)
}
  0x6b   : > { %375 = dma.vmem_to_hbm [thread:$0]  (%p625_p11), %s261_s17, 128, %s263_s29, %s248_s13  }
  0x6c PF: > { %s274_s23 = sand.u32 1, %s546_s9   ;;  %p751_p1 = scmp.ge.s32.totalorder %s558_s12, 2 }
  0x6d   : > { %s275_s30 = scalar_lea.sflag [#allocation4], %s274_s23 }
  0x6e   : > { %p385_p4 = pnand %p751_p1, %p629_p12 }
  0x70   : > { %p386_p7 = pneg %p385_p4 }
  0x72   : > { %541 = dma.done.wait (%p386_p7), %s275_s30, 128  }
  0x73   : > { %543 = vsyncadd (%p386_p7), %s275_s30, 4294967168  ;;  %p18_p5 = scmp.ge.s32.totalorder %s600_s15, 4   ;;  %s752_s9 = smov %s550_s10 }
  0x74   : > { %s753_s10 = smov %s554_s11  ;;  %s754_s11 = smov %s612_s18 }
  0x75   : > { %s755_s12 = smov %s600_s15  ;;  %20 = sbr.rel (!%p18_p5) target bundleno = 7 (0x7), region = 86 }
  0x7a   :  { %281 = vsyncpa [#allocation3], 1 }
  0x7b   :  { %283 = vsyncpa [#allocation3 + $0x1], 1 }
  0x7c   :  { %284 = vsyncpa [#allocation6], 1 }
  0x7d   :  { %286 = vsyncpa [#allocation6 + $0x1], 1 }
  0x7e   :  { %287 = vsyncpa [#allocation4], 1 }
  0x7f   :  { %289 = vsyncpa [#allocation4 + $0x1], 1 }

</bundles_post_ra>
